<compile_context>
chip_gen: v6e
topology: v6e:2x2x1
jax: 0.10.0
libtpu: 0.0.40
codegen_flags: <defaults>
</compile_context>

<pallas_src>
import functools

import jax
import jax.numpy as jnp
from jax.experimental import pallas as pl
from jax.experimental.pallas import tpu as pltpu


def _round_up(x, m):
    return (x + m - 1) // m * m


def _label_smoothing_kernel(tflat_ref, preds_ref, partial_ref, *, eps, inv_eps, ng):
    """One grid step: partial sum of (smooth_targets * predictions) over a row tile.

    tflat_ref:   (TILE_G, K)      int32  flat (packed-row) target column ids
    preds_ref:   (TILE_G, WIDTH)  native dtype, WIDTH = K * C (lane-dense)
    partial_ref: (1, 1)           float32 partial sum (SMEM)
    """
    preds = preds_ref[...].astype(jnp.float32)              # (TILE_G, WIDTH)
    tg, width = preds.shape
    k = tflat_ref.shape[1]

    # Mask rows past the true (packed) batch: grid = cdiv(ng, TILE_G), so the
    # last tile may contain garbage rows which must contribute exactly zero.
    row_ids = jax.lax.broadcasted_iota(jnp.int32, (tg, 1), 0) + pl.program_id(0) * tg
    preds = jnp.where(row_ids < ng, preds, 0.0)

    # Bulk term of the smoothing: inv_eps * sum(all predictions).
    total = preds.sum()

    # Picked term: predictions at the target column of every original row.
    # Each packed sub-row r owns flat columns [r*C, (r+1)*C), so K lane-dense
    # compares (disjoint match ranges) build the combined one-hot.
    col_ids = jax.lax.broadcasted_iota(jnp.int32, (tg, width), 1)
    onehot = col_ids == tflat_ref[:, 0:1]
    for r in range(1, k):
        onehot = jnp.logical_or(onehot, col_ids == tflat_ref[:, r:r + 1])
    picked = jnp.where(onehot, preds, 0.0).sum()

    # (1-eps)*picked + inv_eps*(total - picked), refactored.
    partial_ref[0, 0] = inv_eps * total + (1.0 - eps - inv_eps) * picked


def label_smoothing_loss(predictions, targets, *, epsilon,
                         vmem_budget_bytes=12 * 1024 * 1024):
    """predictions: [N, C] float (any float dtype), targets: [N] int -> f32 loss."""
    n, c = predictions.shape
    itemsize = jnp.dtype(predictions.dtype).itemsize
    # Native sublane multiple: 8 rows for 4-byte, 16 for 2-byte, 32 for 1-byte.
    sub = max(8, 32 // itemsize)

    # ---- Lane-dense packing for small class counts ---------------------------
    # If C divides 128, reshape (N, C) -> (N/K, K*C) so vreg lanes are fully
    # used; targets are remapped to flat column ids t' = (row % K)*C + t.
    # The contiguous row-major reshape is free (no HBM copy).
    k = 1
    if c < 128 and 128 % c == 0:
        cand = min(128 // c, 16)                  # cap the unrolled compare loop
        if n % cand == 0 and n // cand >= sub:
            k = cand
    ng = n // k
    width = k * c
    preds_flat = predictions.reshape(ng, width)
    tgt = targets.astype(jnp.int32)
    tflat = ((jnp.arange(n, dtype=jnp.int32) % k) * c + tgt).reshape(ng, k)

    # ---- Row-tile size: fill the byte budget (no artificial row cap) ---------
    bytes_per_row = max(1, width * itemsize)
    tile_g = max(sub, (vmem_budget_bytes // bytes_per_row) // sub * sub)
    tile_g = min(tile_g, _round_up(ng, sub))
    num_tiles = pl.cdiv(ng, tile_g)

    # TODO(synk): also tile the class axis (grid=(ng/tile_g, C/tile_c), class
    # axis "arbitrary", inv_eps from the GLOBAL C) for vocab-sized heads where
    # even an 8-row tile exceeds the VMEM budget.
    # TODO(synk): verify with pl.lower_as_mlir that the upcast->select->sum
    # chain does not materialize a full f32 temp for bf16 inputs at multi-MiB
    # tiles; if it does, chunk with lax.fori_loop(unroll=True).

    kernel = functools.partial(
        _label_smoothing_kernel,
        eps=float(epsilon),
        inv_eps=float(epsilon) / (c - 1),
        ng=ng,
    )

    partials = pl.pallas_call(
        kernel,
        out_shape=jax.ShapeDtypeStruct((num_tiles, 1), jnp.float32),
        grid=(num_tiles,),
        in_specs=[
            pl.BlockSpec((tile_g, k), lambda i: (i, 0)),        # flat targets
            pl.BlockSpec((tile_g, width), lambda i: (i, 0)),    # predictions
        ],
        out_specs=pl.BlockSpec((1, 1), lambda i: (i, 0),
                               memory_space=pltpu.MemorySpace.SMEM),
        compiler_params=pltpu.CompilerParams(
            dimension_semantics=("parallel",),
            vmem_limit_bytes=48 * 1024 * 1024,   # <= v7x's 64 MiB VMEM/TC
        ),
    )(tflat, preds_flat)

    # Tiny final reduction outside the kernel: -(sum of partials) / N.
    return -(partials.sum()) / jnp.float32(n)


if __name__ == "__main__":
    epsilon = 0.1
    key = jax.random.PRNGKey(0)

    def reference(predictions, targets, eps):
        _, c = predictions.shape
        onehot = jax.nn.one_hot(targets, c, dtype=jnp.float32)
        smooth = onehot * (1.0 - eps) + (1.0 - onehot) * (eps / (c - 1))
        return -(smooth * predictions.astype(jnp.float32)).sum(axis=1).mean()

    # Small deterministic cases exercising: lane-dense packing (C | 128),
    # the masked partial tail (N not a multiple of 8, C not | 128), and a
    # bf16 unpacked path.
    cases = [
        ("packed_lane_dense", 64, 32, jnp.float32),
        ("masked_tail",       50, 40, jnp.float32),
        ("bf16_small_batch",   8, 32, jnp.bfloat16),
    ]
    for name, batch, num_classes, dtype in cases:
        key, kp, kt = jax.random.split(key, 3)
        preds = jax.random.normal(kp, (batch, num_classes), dtype=jnp.float32).astype(dtype)
        tgts = jax.random.randint(kt, (batch,), 0, num_classes, dtype=jnp.int32)

        loss = jax.block_until_ready(
            label_smoothing_loss(preds, tgts, epsilon=epsilon))
        ref = reference(preds, tgts, epsilon)
        assert jnp.allclose(loss, ref, rtol=2e-4, atol=1e-5), (name, loss, ref)

    print("KERNEL_OK")
</pallas_src>

<mosaic_0001>
module attributes {stable_mosaic.version = 11 : i64} {
  func.func @_label_smoothing_kernel(%arg0: i32, %arg1: memref<16x4xi32, #tpu.memory_space<vmem>>, %arg2: memref<16x128xf32, #tpu.memory_space<vmem>>, %arg3: memref<1x1xf32, #tpu.memory_space<smem>>) attributes {dimension_semantics = [#tpu.dimension_semantics<parallel>], iteration_bounds = array<i64: 1>, scalar_prefetch = 0 : i64, scratch_operands = 0 : i64, tpu.core_type = #tpu.core_type<tc>, window_params = [{transform_indices = @transform_0, window_bounds = array<i64: 16, 4>}, {transform_indices = @transform_1, window_bounds = array<i64: 16, 128>}, {transform_indices = @transform_2, window_bounds = array<i64: 1, 1>}]} {
    %c0 = arith.constant 0 : index
    %c0_0 = arith.constant 0 : index
    %0 = vector.load %arg2[%c0, %c0_0] : memref<16x128xf32, #tpu.memory_space<vmem>>, vector<16x128xf32>
    %1 = tpu.iota {dimensions = array<i32: 0>} : vector<16x1xi32>
    %c16_i32 = arith.constant 16 : i32
    %2 = arith.muli %arg0, %c16_i32 : i32
    %3 = vector.broadcast %2 : i32 to vector<16x1xi32>
    %4 = arith.addi %1, %3 : vector<16x1xi32>
    %c16_i32_1 = arith.constant 16 : i32
    %5 = vector.broadcast %c16_i32_1 : i32 to vector<16x1xi32>
    %6 = arith.cmpi slt, %4, %5 : vector<16x1xi32>
    %cst = arith.constant 0.000000e+00 : f32
    %7 = vector.shape_cast %6 : vector<16x1xi1> to vector<16x1xi1>
    %8 = vector.broadcast %7 : vector<16x1xi1> to vector<16x128xi1>
    %9 = vector.broadcast %cst : f32 to vector<16x128xf32>
    %10 = arith.select %8, %0, %9 : vector<16x128xi1>, vector<16x128xf32>
    %11 = vector.shape_cast %10 : vector<16x128xf32> to vector<1x16x128xf32>
    %cst_2 = arith.constant dense<0.000000e+00> : vector<1xf32>
    %12 = vector.multi_reduction <add>, %11, %cst_2 [1, 2] : vector<1x16x128xf32> to vector<1xf32>
    %13 = vector.shape_cast %12 : vector<1xf32> to vector<1x1x1xf32>
    %14 = vector.extract %13[0, 0, 0] : f32 from vector<1x1x1xf32>
    %15 = tpu.iota {dimensions = array<i32: 1>} : vector<16x128xi32>
    %c0_3 = arith.constant 0 : index
    %c0_4 = arith.constant 0 : index
    %16 = vector.load %arg1[%c0_3, %c0_4] : memref<16x4xi32, #tpu.memory_space<vmem>>, vector<16x1xi32>
    %17 = vector.broadcast %16 : vector<16x1xi32> to vector<16x128xi32>
    %18 = arith.cmpi eq, %15, %17 : vector<16x128xi32>
    %c0_5 = arith.constant 0 : index
    %c1 = arith.constant 1 : index
    %19 = vector.load %arg1[%c0_5, %c1] : memref<16x4xi32, #tpu.memory_space<vmem>>, vector<16x1xi32>
    %20 = vector.broadcast %19 : vector<16x1xi32> to vector<16x128xi32>
    %21 = arith.cmpi eq, %15, %20 : vector<16x128xi32>
    %22 = arith.ori %18, %21 : vector<16x128xi1>
    %c0_6 = arith.constant 0 : index
    %c2 = arith.constant 2 : index
    %23 = vector.load %arg1[%c0_6, %c2] : memref<16x4xi32, #tpu.memory_space<vmem>>, vector<16x1xi32>
    %24 = vector.broadcast %23 : vector<16x1xi32> to vector<16x128xi32>
    %25 = arith.cmpi eq, %15, %24 : vector<16x128xi32>
    %26 = arith.ori %22, %25 : vector<16x128xi1>
    %c0_7 = arith.constant 0 : index
    %c3 = arith.constant 3 : index
    %27 = vector.load %arg1[%c0_7, %c3] : memref<16x4xi32, #tpu.memory_space<vmem>>, vector<16x1xi32>
    %28 = vector.broadcast %27 : vector<16x1xi32> to vector<16x128xi32>
    %29 = arith.cmpi eq, %15, %28 : vector<16x128xi32>
    %30 = arith.ori %26, %29 : vector<16x128xi1>
    %cst_8 = arith.constant 0.000000e+00 : f32
    %31 = vector.broadcast %cst_8 : f32 to vector<16x128xf32>
    %32 = arith.select %30, %10, %31 : vector<16x128xi1>, vector<16x128xf32>
    %33 = vector.shape_cast %32 : vector<16x128xf32> to vector<1x16x128xf32>
    %cst_9 = arith.constant dense<0.000000e+00> : vector<1xf32>
    %34 = vector.multi_reduction <add>, %33, %cst_9 [1, 2] : vector<1x16x128xf32> to vector<1xf32>
    %35 = vector.shape_cast %34 : vector<1xf32> to vector<1x1x1xf32>
    %36 = vector.extract %35[0, 0, 0] : f32 from vector<1x1x1xf32>
    %cst_10 = arith.constant 0.0032258064 : f32
    %37 = arith.mulf %cst_10, %14 : f32
    %cst_11 = arith.constant 0.896774172 : f32
    %38 = arith.mulf %cst_11, %36 : f32
    %39 = arith.addf %37, %38 : f32
    %c0_12 = arith.constant 0 : index
    %c0_13 = arith.constant 0 : index
    %40 = memref.load %arg3[%c0_12, %c0_13] : memref<1x1xf32, #tpu.memory_space<smem>>
    memref.store %39, %arg3[%c0_12, %c0_13] : memref<1x1xf32, #tpu.memory_space<smem>>
    return
  }
  func.func @transform_0(%arg0: i32) -> (i32, i32) {
    %c0_i32 = arith.constant 0 : i32
    %c0_i32_0 = arith.constant 0 : i32
    return %arg0, %c0_i32 : i32, i32
  }
  func.func @transform_1(%arg0: i32) -> (i32, i32) {
    %c0_i32 = arith.constant 0 : i32
    %c0_i32_0 = arith.constant 0 : i32
    return %arg0, %c0_i32 : i32, i32
  }
  func.func @transform_2(%arg0: i32) -> (i32, i32) {
    %c0_i32 = arith.constant 0 : i32
    %c0_i32_0 = arith.constant 0 : i32
    return %arg0, %c0_i32 : i32, i32
  }
}

</mosaic_0001>

<bundles_post_ra>
// kernel: tpu_custom_call.1
= control target key start
LH: loop header
LB: loop body
LE: loop exit
PB: predicated region body
PF: predicated region fallthrough
CT: control target
= control target key end

     0   :  { %v136_v1 = vmov 1   ;;  %v137_v2 = vmov 0   ;;  %s171_s0 = inlined_call_operand.vmem [shape: s32[16,4], index: 0, kind: input, shape index: {}]   ;;  %s172_s1 = inlined_call_operand.vmem [shape: f32[16,128], index: 1, kind: input, shape index: {}]   ;;  %s173_s2 = inlined_call_operand.hbm [shape: f32[1,1], index: 2, kind: output, shape index: {}]  }
   0x1   :  { %v41_v0 = vld [vmem:[%s171_s0] sm:$0xff]  ;;  %121 = vset.pattern.permute.xlu1 %v136_v1  ;;  %120 = vset.pattern.permute.xlu0 %v137_v2 }
   0x2   :  { %7 = vsyncpa [#allocation3], 0  ;;  %52 = vperm.xlu1 %121, %v41_v0   ;;  %44 = vperm.xlu0 %120, %v41_v0   ;;  %v42_v3 = vld [vmem:[%s171_s0 + $0x8] sm:$0xff]  ;;  %v138_v4 = vmov 2   ;;  %v139_v5 = vmov 3   ;;  %v12_v6 = vld [vmem:[%s172_s1] sm:$0xff]  ;;  %v39_v11 = vlaneseq }
   0x3   :  { %v13_v7 = vld [vmem:[%s172_s1 + $0x8] sm:$0xff]  ;;  %s140_s20 = smov [#allocation2]  }
   0x4   :  { %v29_v8 = vadd.f32 %v13_v7, %v12_v6  ;;  %v40_v14 = vand.u32 127, %v39_v11 }
   0x6   :  { %55 = vperm.xlu1 %121, %v42_v3   ;;  %47 = vperm.xlu0 %120, %v42_v3  }
   0xa   :  { %123 = vset.pattern.permute.xlu1 %v138_v4  ;;  %122 = vset.pattern.permute.xlu0 %v138_v4 }
   0xb   :  { %65 = vperm.xlu1 %123, %v42_v3   ;;  %62 = vperm.xlu0 %122, %v41_v0  }
   0xf   :  { %124 = vset.pattern.permute.xlu1 %v139_v5  ;;  %125 = vset.pattern.permute.xlu0 %v139_v5 }
  0x10   :  { %72 = vperm.xlu1 %124, %v41_v0   ;;  %75 = vperm.xlu0 %125, %v42_v3  }
  0x34   :  { %30 = vadd.xlane.f32.xlu1 %v29_v8 }
  0x7d   :  { %v53_v9 = vpop.permute.xlu1 %52  ;;  %v45_v10 = vpop.permute.xlu0 %44 }
  0x7e   :  { %vm57_vm0 = vcmp.eq.s32.totalorder %v40_v14, %v53_v9  ;;  %vm49_vm1 = vcmp.eq.s32.totalorder %v40_v14, %v45_v10 }
  0x7f   :  { %vm59_vm5 = vmor %vm49_vm1, %vm57_vm0 }
  0x81   :  { %v56_v12 = vpop.permute.xlu1 %55  ;;  %v48_v13 = vpop.permute.xlu0 %47 }
  0x82   :  { %vm58_vm2 = vcmp.eq.s32.totalorder %v40_v14, %v56_v12  ;;  %vm50_vm3 = vcmp.eq.s32.totalorder %v40_v14, %v48_v13 }
  0x83   :  { %vm60_vm7 = vmor %vm50_vm3, %vm58_vm2 }
  0x86   :  { %v66_v15 = vpop.permute.xlu1 %65  ;;  %v63_v16 = vpop.permute.xlu0 %62 }
  0x87   :  { %vm68_vm4 = vcmp.eq.s32.totalorder %v40_v14, %v66_v15  ;;  %vm67_vm6 = vcmp.eq.s32.totalorder %v40_v14, %v63_v16 }
  0x88   :  { %vm70_vm8 = vmor %vm60_vm7, %vm68_vm4 }
  0x89   :  { %vm69_vm9 = vmor %vm59_vm5, %vm67_vm6 }
  0x8b   :  { %v73_v17 = vpop.permute.xlu1 %72  ;;  %v76_v18 = vpop.permute.xlu0 %75 }
  0x8c   :  { %vm77_vm10 = vcmp.eq.s32.totalorder %v40_v14, %v73_v17  ;;  %vm78_vm11 = vcmp.eq.s32.totalorder %v40_v14, %v76_v18 }
  0x8d   :  { %vm79_vm12 = vmor %vm69_vm9, %vm77_vm10 }
  0x8e   :  { %vm80_vm13 = vmor %vm70_vm8, %vm78_vm11  ;;  %v81_v19 = vsel %vm79_vm12, %v12_v6, 0.0 }
  0x8f   :  { %v82_v20 = vsel %vm80_vm13, %v13_v7, 0.0 }
  0x90   :  { %v83_v21 = vadd.f32 %v82_v20, %v81_v19 }
  0x92   :  { %84 = vadd.xlane.f32.xlu0 %v83_v21 }
  0xbd   :  { %v31_v22 = vpop.xlane.xlu1 %30 }
  0xbe   :  { %v32_v23 = vrot.slane %v31_v22, 4 }
  0xc0   :  { %v33_v24 = vadd.f32 %v32_v23, %v31_v22 }
  0xc2   :  { %v34_v25 = vrot.slane %v33_v24, 2 }
  0xc4   :  { %v35_v26 = vadd.f32 %v34_v25, %v33_v24 }
  0xc6   :  { %v36_v27 = vrot.slane %v35_v26, 1 }
  0xc8   :  { %v37_v28 = vadd.f32 %v36_v27, %v35_v26 }
  0xca   :  { %111 = vpush %v37_v28 }
  0xfb   :  { %s112_s0 = spop %111 }
  0xfc   :  { %s93_s1 = smul.f32 0.0032258064, %s112_s0 }
 0x11b   :  { %v85_v29 = vpop.xlane.xlu0 %84 }
 0x11c   :  { %v86_v30 = vrot.slane %v85_v29, 4 }
 0x11e   :  { %v87_v31 = vadd.f32 %v86_v30, %v85_v29 }
 0x120   :  { %v88_v32 = vrot.slane %v87_v31, 2 }
 0x122   :  { %v89_v33 = vadd.f32 %v88_v32, %v87_v31 }
 0x124   :  { %v90_v34 = vrot.slane %v89_v33, 1 }
 0x126   :  { %v91_v35 = vadd.f32 %v90_v34, %v89_v33 }
 0x128   :  { %113 = vpush %v91_v35 }
 0x159   :  { %s114_s17 = spop %113 }
 0x15a   :  { %s94_s18 = smul.f32 0.8967742, %s114_s17 }
 0x15c   :  { %s95_s19 = sadd.f32 %s94_s18, %s93_s1 }
 0x15e   :  { %97 = sst [smem:[#allocation2]] %s95_s19 }
 0x15f   :  { %105 = dma.smem_to_hbm %s140_s20, 16, %s173_s2, [#allocation3]  }
 0x160   :  { %134 = dma.done.wait [#allocation3], 16  }
 0x161   :  { %135 = vsyncadd [#allocation3], 4294967280 }
 0x162   :  { %109 = sfence }
 0x163   :  { %110 = vsyncpa [#allocation3], 1 }

</bundles_post_ra>
